<compile_context>
chip_gen: v6e
topology: v6e:2x2x1
jax: 0.10.0
libtpu: 0.0.40
codegen_flags: <defaults>
</compile_context>

<pallas_src>
import functools

import jax
import jax.numpy as jnp
from jax.experimental import pallas as pl
from jax.experimental.pallas import tpu as pltpu


def _layernorm(h, w, b, eps=1e-5):
    mu = jnp.mean(h, axis=-1, keepdims=True)
    var = jnp.mean((h - mu) ** 2, axis=-1, keepdims=True)
    return (h - mu) * jax.lax.rsqrt(var + eps) * w + b


def down_transformer_kernel(
    x_ref, pos_ref, wq_ref, wk_ref, wv_ref, wproj_ref, bproj_ref,
    n1w_ref, n1b_ref, n2w_ref, n2b_ref,
    w1_ref, b1_ref, w2_ref, b2_ref, prelu_ref,
    out_ref, *, bt, n, c):
    R = bt * n
    Ch = c // 2
    bf16 = jnp.bfloat16
    f32 = jnp.float32

    # x += pos_embed  (f32), then fold batch into the matmul M dimension.
    x3 = x_ref[...] + pos_ref[...][None]               # (Bt, N, C)
    xf = x3.reshape(R, c)                               # (Bt*N, C)
    xb = xf.astype(bf16)

    # ---- MultiHeadAttention (num_heads = 1, head_dim = C) ----
    # scale already folded into Wq in the wrapper.
    q = jnp.dot(xb, wq_ref[...], preferred_element_type=f32)   # (R, C)
    k = jnp.dot(xb, wk_ref[...], preferred_element_type=f32)
    v = jnp.dot(xb, wv_ref[...], preferred_element_type=f32)
    q3 = q.reshape(bt, n, c).astype(bf16)
    k3 = k.reshape(bt, n, c).astype(bf16)
    v3 = v.reshape(bt, n, c).astype(bf16)

    s = jnp.einsum("bnc,bmc->bnm", q3, k3, preferred_element_type=f32)  # (Bt,N,N)
    s = s - jnp.max(s, axis=-1, keepdims=True)
    p = jnp.exp(s)
    p = p * pl.reciprocal(jnp.sum(p, axis=-1, keepdims=True), approx=True)
    av = jnp.einsum("bnm,bmc->bnc", p.astype(bf16), v3,
                    preferred_element_type=f32)                          # (Bt,N,C)
    avf = av.reshape(R, c).astype(bf16)
    attn_out = (jnp.dot(avf, wproj_ref[...], preferred_element_type=f32)
                + bproj_ref[...])

    # ---- x = norm1(x + attn(x)) ----
    h = _layernorm(xf + attn_out, n1w_ref[...], n1b_ref[...])

    # ---- MLP: Linear(C,4C) -> Dropout(eval=id) -> PReLU -> Linear(4C,C) ----
    m = jnp.dot(h.astype(bf16), w1_ref[...], preferred_element_type=f32) + b1_ref[...]
    a = prelu_ref[0]                                     # SMEM scalar
    m = jnp.where(m >= 0, m, a * m)                      # PReLU
    m = jnp.dot(m.astype(bf16), w2_ref[...], preferred_element_type=f32) + b2_ref[...]

    # ---- x = norm2(x + mlp(x)) ----
    h2 = _layernorm(h + m, n2w_ref[...], n2b_ref[...])

    # ---- MaxPool1d(2) over channels ----
    # Channels were pre-permuted to [even | odd] in the wrapper, so the pool of
    # adjacent original channels is just the max of the two contiguous halves.
    out_ref[...] = jnp.maximum(h2[:, :Ch], h2[:, Ch:])


def down_transformer(x, params, *, batch_block=None):
    B, N, C = x.shape
    Ch = C // 2
    (pos, wq_t, wk_t, wv_t, wproj_t, bproj, n1w, n1b, n2w, n2b,
     w1_t, b1, prelu_a, w2_t, b2) = params
    scale = float(C) ** (-0.5)        # head_dim = C since num_heads = 1

    # Residual-stream channel permutation [0,2,4,...,1,3,5,...] (bijection), so
    # pooled[j] = max(h2[2j], h2[2j+1]) == max(h2_perm[j], h2_perm[j+C/2]).
    perm = jnp.concatenate([jnp.arange(0, C, 2), jnp.arange(1, C, 2)])

    bf16 = jnp.bfloat16
    xp = x[..., perm]
    posp = pos[:, perm]
    wq_p = ((wq_t * scale)[perm, :]).astype(bf16)   # fold attention scale into Wq
    wk_p = wk_t[perm, :].astype(bf16)
    wv_p = wv_t[perm, :].astype(bf16)
    wproj_p = wproj_t[:, perm].astype(bf16)
    bproj_p = bproj[:, perm]
    n1w_p, n1b_p = n1w[:, perm], n1b[:, perm]
    n2w_p, n2b_p = n2w[:, perm], n2b[:, perm]
    w1_p = w1_t[perm, :].astype(bf16)
    w2_p = w2_t[:, perm].astype(bf16)
    b2_p = b2[:, perm]
    prelu = prelu_a.reshape(1)

    # Batch Bt elements per grid step (fattens matmul M dim, amortizes per-step
    # overhead).  Pick a divisor of B.
    Bt = batch_block if batch_block is not None else min(B, 8)
    while B % Bt:
        Bt -= 1
    grid = (B // Bt,)

    const = lambda b: (0, 0)
    in_specs = [
        pl.BlockSpec((Bt, N, C), lambda b: (b, 0, 0)),  # x (permuted channels)
        pl.BlockSpec((N, C), const),                    # pos_embed
        pl.BlockSpec((C, C), const),                    # Wq^T (scaled)
        pl.BlockSpec((C, C), const),                    # Wk^T
        pl.BlockSpec((C, C), const),                    # Wv^T
        pl.BlockSpec((C, C), const),                    # Wproj^T
        pl.BlockSpec((1, C), const),                    # b_proj
        pl.BlockSpec((1, C), const),                    # norm1 weight
        pl.BlockSpec((1, C), const),                    # norm1 bias
        pl.BlockSpec((1, C), const),                    # norm2 weight
        pl.BlockSpec((1, C), const),                    # norm2 bias
        pl.BlockSpec((C, 4 * C), const),                # W_mlp1^T
        pl.BlockSpec((1, 4 * C), const),                # b_mlp1
        pl.BlockSpec((4 * C, C), const),                # W_mlp2^T
        pl.BlockSpec((1, C), const),                    # b_mlp2
        pl.BlockSpec(memory_space=pltpu.MemorySpace.SMEM),  # PReLU a (scalar)
    ]
    kernel = functools.partial(down_transformer_kernel, bt=Bt, n=N, c=C)
    out_flat = pl.pallas_call(
        kernel,
        grid=grid,
        in_specs=in_specs,
        out_specs=pl.BlockSpec((Bt * N, Ch), lambda b: (b, 0)),
        out_shape=jax.ShapeDtypeStruct((B * N, Ch), jnp.float32),
        compiler_params=pltpu.CompilerParams(
            dimension_semantics=("parallel",),
            vmem_limit_bytes=48 * 1024 * 1024,
        ),
    )(xp, posp, wq_p, wk_p, wv_p, wproj_p, bproj_p,
      n1w_p, n1b_p, n2w_p, n2b_p, w1_p, b1, w2_p, b2_p, prelu)
    return out_flat.reshape(B, N, Ch)


def init_params(key, dim, seq_len):
    C = dim
    ks = jax.random.split(key, 10)

    def lin(k, fan_in, shape):
        bound = 1.0 / float(fan_in) ** 0.5
        return jax.random.uniform(k, shape, jnp.float32, -bound, bound)

    pos_embed = 0.02 * jax.random.normal(ks[0], (seq_len, C), jnp.float32)
    wq_t = lin(ks[1], C, (C, C))               # qkv Linear (bias=False), split + transposed
    wk_t = lin(ks[2], C, (C, C))
    wv_t = lin(ks[3], C, (C, C))
    wproj_t = lin(ks[4], C, (C, C))            # proj Linear weight, transposed
    bproj = lin(ks[5], C, (1, C))
    n1w, n1b = jnp.ones((1, C), jnp.float32), jnp.zeros((1, C), jnp.float32)
    n2w, n2b = jnp.ones((1, C), jnp.float32), jnp.zeros((1, C), jnp.float32)
    w1_t = lin(ks[6], C, (C, 4 * C))
    b1 = lin(ks[7], C, (1, 4 * C))
    prelu_a = jnp.full((1,), 0.25, jnp.float32)
    w2_t = lin(ks[8], 4 * C, (4 * C, C))
    b2 = lin(ks[9], 4 * C, (1, C))
    return (pos_embed, wq_t, wk_t, wv_t, wproj_t, bproj, n1w, n1b, n2w, n2b,
            w1_t, b1, prelu_a, w2_t, b2)


def reference(x, params):
    """Pure-JAX f32 reference mirroring the PyTorch forward (eval mode)."""
    (pos, wq_t, wk_t, wv_t, wproj_t, bproj, n1w, n1b, n2w, n2b,
     w1_t, b1, prelu_a, w2_t, b2) = params
    B, N, C = x.shape
    scale = float(C) ** (-0.5)
    x = x + pos[None]
    q = (x @ wq_t) * scale
    k = x @ wk_t
    v = x @ wv_t
    attn = jax.nn.softmax(jnp.einsum("bnc,bmc->bnm", q, k), axis=-1)
    ao = jnp.einsum("bnm,bmc->bnc", attn, v) @ wproj_t + bproj[None]
    h = _layernorm(x + ao, n1w[None], n1b[None])
    m = h @ w1_t + b1[None]
    a = prelu_a[0]
    m = jnp.where(m >= 0, m, a * m)
    m = m @ w2_t + b2[None]
    h2 = _layernorm(h + m, n2w[None], n2b[None])
    return jnp.max(h2.reshape(B, N, C // 2, 2), axis=-1)


if __name__ == "__main__":
    B, N, C = 2, 8, 32  # batch, seq_length, input_dim
    key = jax.random.PRNGKey(0)
    kx, kp = jax.random.split(key)
    x = jax.random.normal(kx, (B, N, C), jnp.float32)
    params = init_params(kp, C, N)

    out = jax.block_until_ready(down_transformer(x, params))
    ref = reference(x, params)
    assert out.shape == (B, N, C // 2), out.shape
    max_err = float(jnp.max(jnp.abs(out - ref)))
    # bf16 MXU matmuls + approx reciprocal => loosened tolerance vs f32 reference.
    assert jnp.allclose(out, ref, atol=5e-2, rtol=5e-2), max_err
    print("KERNEL_OK")
</pallas_src>

<mosaic_0001>
module attributes {stable_mosaic.version = 11 : i64} {
  func.func @down_transformer_kernel(%arg0: i32, %arg1: memref<2x8x32xf32, #tpu.memory_space<vmem>>, %arg2: memref<8x32xf32, #tpu.memory_space<vmem>>, %arg3: memref<32x32xbf16, #tpu.memory_space<vmem>>, %arg4: memref<32x32xbf16, #tpu.memory_space<vmem>>, %arg5: memref<32x32xbf16, #tpu.memory_space<vmem>>, %arg6: memref<32x32xbf16, #tpu.memory_space<vmem>>, %arg7: memref<1x32xf32, #tpu.memory_space<vmem>>, %arg8: memref<1x32xf32, #tpu.memory_space<vmem>>, %arg9: memref<1x32xf32, #tpu.memory_space<vmem>>, %arg10: memref<1x32xf32, #tpu.memory_space<vmem>>, %arg11: memref<1x32xf32, #tpu.memory_space<vmem>>, %arg12: memref<32x128xbf16, #tpu.memory_space<vmem>>, %arg13: memref<1x128xf32, #tpu.memory_space<vmem>>, %arg14: memref<128x32xbf16, #tpu.memory_space<vmem>>, %arg15: memref<1x32xf32, #tpu.memory_space<vmem>>, %arg16: memref<1xf32, #tpu.memory_space<smem>>, %arg17: memref<16x16xf32, #tpu.memory_space<vmem>>) attributes {dimension_semantics = [#tpu.dimension_semantics<parallel>], iteration_bounds = array<i64: 1>, scalar_prefetch = 0 : i64, scratch_operands = 0 : i64, tpu.core_type = #tpu.core_type<tc>, window_params = [{transform_indices = @transform_0, window_bounds = array<i64: 2, 8, 32>}, {pipeline_mode = #tpu.pipeline_mode<synchronous>, transform_indices = @transform_1, window_bounds = array<i64: 8, 32>}, {pipeline_mode = #tpu.pipeline_mode<synchronous>, transform_indices = @transform_2, window_bounds = array<i64: 32, 32>}, {pipeline_mode = #tpu.pipeline_mode<synchronous>, transform_indices = @transform_3, window_bounds = array<i64: 32, 32>}, {pipeline_mode = #tpu.pipeline_mode<synchronous>, transform_indices = @transform_4, window_bounds = array<i64: 32, 32>}, {pipeline_mode = #tpu.pipeline_mode<synchronous>, transform_indices = @transform_5, window_bounds = array<i64: 32, 32>}, {pipeline_mode = #tpu.pipeline_mode<synchronous>, transform_indices = @transform_6, window_bounds = array<i64: 1, 32>}, {pipeline_mode = #tpu.pipeline_mode<synchronous>, transform_indices = @transform_7, window_bounds = array<i64: 1, 32>}, {pipeline_mode = #tpu.pipeline_mode<synchronous>, transform_indices = @transform_8, window_bounds = array<i64: 1, 32>}, {pipeline_mode = #tpu.pipeline_mode<synchronous>, transform_indices = @transform_9, window_bounds = array<i64: 1, 32>}, {pipeline_mode = #tpu.pipeline_mode<synchronous>, transform_indices = @transform_10, window_bounds = array<i64: 1, 32>}, {pipeline_mode = #tpu.pipeline_mode<synchronous>, transform_indices = @transform_11, window_bounds = array<i64: 32, 128>}, {pipeline_mode = #tpu.pipeline_mode<synchronous>, transform_indices = @transform_12, window_bounds = array<i64: 1, 128>}, {pipeline_mode = #tpu.pipeline_mode<synchronous>, transform_indices = @transform_13, window_bounds = array<i64: 128, 32>}, {pipeline_mode = #tpu.pipeline_mode<synchronous>, transform_indices = @transform_14, window_bounds = array<i64: 1, 32>}, {transform_indices = @transform_15, window_bounds = array<i64: 1>}, {transform_indices = @transform_16, window_bounds = array<i64: 16, 16>}]} {
    %c0 = arith.constant 0 : index
    %c0_0 = arith.constant 0 : index
    %c0_1 = arith.constant 0 : index
    %0 = vector.load %arg1[%c0, %c0_0, %c0_1] : memref<2x8x32xf32, #tpu.memory_space<vmem>>, vector<2x8x32xf32>
    %c0_2 = arith.constant 0 : index
    %c0_3 = arith.constant 0 : index
    %1 = vector.load %arg2[%c0_2, %c0_3] : memref<8x32xf32, #tpu.memory_space<vmem>>, vector<8x32xf32>
    %2 = vector.shape_cast %1 : vector<8x32xf32> to vector<1x8x32xf32>
    %3 = vector.broadcast %2 : vector<1x8x32xf32> to vector<2x8x32xf32>
    %4 = arith.addf %0, %3 : vector<2x8x32xf32>
    %5 = vector.shape_cast %4 : vector<2x8x32xf32> to vector<16x32xf32>
    %6 = arith.truncf %5 : vector<16x32xf32> to vector<16x32xbf16>
    %c0_4 = arith.constant 0 : index
    %c0_5 = arith.constant 0 : index
    %7 = vector.load %arg3[%c0_4, %c0_5] : memref<32x32xbf16, #tpu.memory_space<vmem>>, vector<32x32xbf16>
    %cst = arith.constant dense<0.000000e+00> : vector<16x32xf32>
    %8 = tpu.matmul %6, %7, %cst {dimension_numbers = #tpu.dot_dimension_numbers<[1], [0], [0], [1], [0, 0, 1, 1], [], []>} : vector<16x32xbf16>, vector<32x32xbf16>, vector<16x32xf32> -> vector<16x32xf32>
    %c0_6 = arith.constant 0 : index
    %c0_7 = arith.constant 0 : index
    %9 = vector.load %arg4[%c0_6, %c0_7] : memref<32x32xbf16, #tpu.memory_space<vmem>>, vector<32x32xbf16>
    %cst_8 = arith.constant dense<0.000000e+00> : vector<16x32xf32>
    %10 = tpu.matmul %6, %9, %cst_8 {dimension_numbers = #tpu.dot_dimension_numbers<[1], [0], [0], [1], [0, 0, 1, 1], [], []>} : vector<16x32xbf16>, vector<32x32xbf16>, vector<16x32xf32> -> vector<16x32xf32>
    %c0_9 = arith.constant 0 : index
    %c0_10 = arith.constant 0 : index
    %11 = vector.load %arg5[%c0_9, %c0_10] : memref<32x32xbf16, #tpu.memory_space<vmem>>, vector<32x32xbf16>
    %cst_11 = arith.constant dense<0.000000e+00> : vector<16x32xf32>
    %12 = tpu.matmul %6, %11, %cst_11 {dimension_numbers = #tpu.dot_dimension_numbers<[1], [0], [0], [1], [0, 0, 1, 1], [], []>} : vector<16x32xbf16>, vector<32x32xbf16>, vector<16x32xf32> -> vector<16x32xf32>
    %13 = vector.shape_cast %8 : vector<16x32xf32> to vector<2x8x32xf32>
    %14 = arith.truncf %13 : vector<2x8x32xf32> to vector<2x8x32xbf16>
    %15 = vector.shape_cast %10 : vector<16x32xf32> to vector<2x8x32xf32>
    %16 = arith.truncf %15 : vector<2x8x32xf32> to vector<2x8x32xbf16>
    %17 = vector.shape_cast %12 : vector<16x32xf32> to vector<2x8x32xf32>
    %18 = arith.truncf %17 : vector<2x8x32xf32> to vector<2x8x32xbf16>
    "tpu.trace_start"() <{level = 10 : i32, message = "bnc,bmc->bnm"}> : () -> ()
    %cst_12 = arith.constant dense<0.000000e+00> : vector<2x8x8xf32>
    %19 = tpu.matmul %14, %16, %cst_12 {dimension_numbers = #tpu.dot_dimension_numbers<[2], [2], [1], [1], [0, 0, 0, 1, 1, 1], [0], [0]>} : vector<2x8x32xbf16>, vector<2x8x32xbf16>, vector<2x8x8xf32> -> vector<2x8x8xf32>
    "tpu.trace_stop"() : () -> ()
    %cst_13 = arith.constant dense<0xFF800000> : vector<2x8xf32>
    %20 = vector.multi_reduction <maximumf>, %19, %cst_13 [2] : vector<2x8x8xf32> to vector<2x8xf32>
    %21 = vector.shape_cast %20 : vector<2x8xf32> to vector<2x8x1xf32>
    %22 = vector.broadcast %21 : vector<2x8x1xf32> to vector<2x8x8xf32>
    %23 = arith.subf %19, %22 : vector<2x8x8xf32>
    %24 = math.exp %23 : vector<2x8x8xf32>
    %cst_14 = arith.constant dense<0.000000e+00> : vector<2x8xf32>
    %25 = vector.multi_reduction <add>, %24, %cst_14 [2] : vector<2x8x8xf32> to vector<2x8xf32>
    %26 = vector.shape_cast %25 : vector<2x8xf32> to vector<2x8x1xf32>
    %27 = tpu.reciprocal %26 {approx = true} : vector<2x8x1xf32> -> vector<2x8x1xf32>
    %28 = vector.broadcast %27 : vector<2x8x1xf32> to vector<2x8x8xf32>
    %29 = arith.mulf %24, %28 : vector<2x8x8xf32>
    %30 = arith.truncf %29 : vector<2x8x8xf32> to vector<2x8x8xbf16>
    "tpu.trace_start"() <{level = 10 : i32, message = "bnm,bmc->bnc"}> : () -> ()
    %cst_15 = arith.constant dense<0.000000e+00> : vector<2x8x32xf32>
    %31 = tpu.matmul %30, %18, %cst_15 {dimension_numbers = #tpu.dot_dimension_numbers<[2], [1], [1], [2], [0, 0, 0, 1, 1, 2], [0], [0]>} : vector<2x8x8xbf16>, vector<2x8x32xbf16>, vector<2x8x32xf32> -> vector<2x8x32xf32>
    "tpu.trace_stop"() : () -> ()
    %32 = vector.shape_cast %31 : vector<2x8x32xf32> to vector<16x32xf32>
    %33 = arith.truncf %32 : vector<16x32xf32> to vector<16x32xbf16>
    %c0_16 = arith.constant 0 : index
    %c0_17 = arith.constant 0 : index
    %34 = vector.load %arg6[%c0_16, %c0_17] : memref<32x32xbf16, #tpu.memory_space<vmem>>, vector<32x32xbf16>
    %cst_18 = arith.constant dense<0.000000e+00> : vector<16x32xf32>
    %35 = tpu.matmul %33, %34, %cst_18 {dimension_numbers = #tpu.dot_dimension_numbers<[1], [0], [0], [1], [0, 0, 1, 1], [], []>} : vector<16x32xbf16>, vector<32x32xbf16>, vector<16x32xf32> -> vector<16x32xf32>
    %c0_19 = arith.constant 0 : index
    %c0_20 = arith.constant 0 : index
    %36 = vector.load %arg7[%c0_19, %c0_20] : memref<1x32xf32, #tpu.memory_space<vmem>>, vector<1x32xf32>
    %37 = vector.broadcast %36 : vector<1x32xf32> to vector<16x32xf32>
    %38 = arith.addf %35, %37 : vector<16x32xf32>
    %39 = arith.addf %5, %38 : vector<16x32xf32>
    %c0_21 = arith.constant 0 : index
    %c0_22 = arith.constant 0 : index
    %40 = vector.load %arg8[%c0_21, %c0_22] : memref<1x32xf32, #tpu.memory_space<vmem>>, vector<1x32xf32>
    %c0_23 = arith.constant 0 : index
    %c0_24 = arith.constant 0 : index
    %41 = vector.load %arg9[%c0_23, %c0_24] : memref<1x32xf32, #tpu.memory_space<vmem>>, vector<1x32xf32>
    %cst_25 = arith.constant dense<0.000000e+00> : vector<16xf32>
    %42 = vector.multi_reduction <add>, %39, %cst_25 [1] : vector<16x32xf32> to vector<16xf32>
    %43 = vector.shape_cast %42 : vector<16xf32> to vector<16x1xf32>
    %cst_26 = arith.constant 3.200000e+01 : f32
    %44 = vector.broadcast %cst_26 : f32 to vector<16x1xf32>
    %45 = arith.divf %43, %44 : vector<16x1xf32>
    %46 = vector.broadcast %45 : vector<16x1xf32> to vector<16x32xf32>
    %47 = arith.subf %39, %46 : vector<16x32xf32>
    %48 = arith.mulf %47, %47 : vector<16x32xf32>
    %cst_27 = arith.constant dense<0.000000e+00> : vector<16xf32>
    %49 = vector.multi_reduction <add>, %48, %cst_27 [1] : vector<16x32xf32> to vector<16xf32>
    %50 = vector.shape_cast %49 : vector<16xf32> to vector<16x1xf32>
    %cst_28 = arith.constant 3.200000e+01 : f32
    %51 = vector.broadcast %cst_28 : f32 to vector<16x1xf32>
    %52 = arith.divf %50, %51 : vector<16x1xf32>
    %53 = vector.broadcast %45 : vector<16x1xf32> to vector<16x32xf32>
    %54 = arith.subf %39, %53 : vector<16x32xf32>
    %cst_29 = arith.constant 9.99999974E-6 : f32
    %55 = vector.broadcast %cst_29 : f32 to vector<16x1xf32>
    %56 = arith.addf %52, %55 : vector<16x1xf32>
    %57 = math.rsqrt %56 : vector<16x1xf32>
    %58 = vector.broadcast %57 : vector<16x1xf32> to vector<16x32xf32>
    %59 = arith.mulf %54, %58 : vector<16x32xf32>
    %60 = vector.broadcast %40 : vector<1x32xf32> to vector<16x32xf32>
    %61 = arith.mulf %59, %60 : vector<16x32xf32>
    %62 = vector.broadcast %41 : vector<1x32xf32> to vector<16x32xf32>
    %63 = arith.addf %61, %62 : vector<16x32xf32>
    %64 = arith.truncf %63 : vector<16x32xf32> to vector<16x32xbf16>
    %c0_30 = arith.constant 0 : index
    %c0_31 = arith.constant 0 : index
    %65 = vector.load %arg12[%c0_30, %c0_31] : memref<32x128xbf16, #tpu.memory_space<vmem>>, vector<32x128xbf16>
    %cst_32 = arith.constant dense<0.000000e+00> : vector<16x128xf32>
    %66 = tpu.matmul %64, %65, %cst_32 {dimension_numbers = #tpu.dot_dimension_numbers<[1], [0], [0], [1], [0, 0, 1, 1], [], []>} : vector<16x32xbf16>, vector<32x128xbf16>, vector<16x128xf32> -> vector<16x128xf32>
    %c0_33 = arith.constant 0 : index
    %c0_34 = arith.constant 0 : index
    %67 = vector.load %arg13[%c0_33, %c0_34] : memref<1x128xf32, #tpu.memory_space<vmem>>, vector<1x128xf32>
    %68 = vector.broadcast %67 : vector<1x128xf32> to vector<16x128xf32>
    %69 = arith.addf %66, %68 : vector<16x128xf32>
    %c0_35 = arith.constant 0 : index
    %70 = memref.load %arg16[%c0_35] : memref<1xf32, #tpu.memory_space<smem>>
    %cst_36 = arith.constant 0.000000e+00 : f32
    %71 = vector.broadcast %cst_36 : f32 to vector<16x128xf32>
    %72 = arith.cmpf oge, %69, %71 : vector<16x128xf32>
    %73 = vector.broadcast %70 : f32 to vector<16x128xf32>
    %74 = arith.mulf %73, %69 : vector<16x128xf32>
    %75 = arith.select %72, %69, %74 : vector<16x128xi1>, vector<16x128xf32>
    %76 = arith.truncf %75 : vector<16x128xf32> to vector<16x128xbf16>
    %c0_37 = arith.constant 0 : index
    %c0_38 = arith.constant 0 : index
    %77 = vector.load %arg14[%c0_37, %c0_38] : memref<128x32xbf16, #tpu.memory_space<vmem>>, vector<128x32xbf16>
    %cst_39 = arith.constant dense<0.000000e+00> : vector<16x32xf32>
    %78 = tpu.matmul %76, %77, %cst_39 {dimension_numbers = #tpu.dot_dimension_numbers<[1], [0], [0], [1], [0, 0, 1, 1], [], []>} : vector<16x128xbf16>, vector<128x32xbf16>, vector<16x32xf32> -> vector<16x32xf32>
    %c0_40 = arith.constant 0 : index
    %c0_41 = arith.constant 0 : index
    %79 = vector.load %arg15[%c0_40, %c0_41] : memref<1x32xf32, #tpu.memory_space<vmem>>, vector<1x32xf32>
    %80 = vector.broadcast %79 : vector<1x32xf32> to vector<16x32xf32>
    %81 = arith.addf %78, %80 : vector<16x32xf32>
    %82 = arith.addf %63, %81 : vector<16x32xf32>
    %c0_42 = arith.constant 0 : index
    %c0_43 = arith.constant 0 : index
    %83 = vector.load %arg10[%c0_42, %c0_43] : memref<1x32xf32, #tpu.memory_space<vmem>>, vector<1x32xf32>
    %c0_44 = arith.constant 0 : index
    %c0_45 = arith.constant 0 : index
    %84 = vector.load %arg11[%c0_44, %c0_45] : memref<1x32xf32, #tpu.memory_space<vmem>>, vector<1x32xf32>
    %cst_46 = arith.constant dense<0.000000e+00> : vector<16xf32>
    %85 = vector.multi_reduction <add>, %82, %cst_46 [1] : vector<16x32xf32> to vector<16xf32>
    %86 = vector.shape_cast %85 : vector<16xf32> to vector<16x1xf32>
    %cst_47 = arith.constant 3.200000e+01 : f32
    %87 = vector.broadcast %cst_47 : f32 to vector<16x1xf32>
    %88 = arith.divf %86, %87 : vector<16x1xf32>
    %89 = vector.broadcast %88 : vector<16x1xf32> to vector<16x32xf32>
    %90 = arith.subf %82, %89 : vector<16x32xf32>
    %91 = arith.mulf %90, %90 : vector<16x32xf32>
    %cst_48 = arith.constant dense<0.000000e+00> : vector<16xf32>
    %92 = vector.multi_reduction <add>, %91, %cst_48 [1] : vector<16x32xf32> to vector<16xf32>
    %93 = vector.shape_cast %92 : vector<16xf32> to vector<16x1xf32>
    %cst_49 = arith.constant 3.200000e+01 : f32
    %94 = vector.broadcast %cst_49 : f32 to vector<16x1xf32>
    %95 = arith.divf %93, %94 : vector<16x1xf32>
    %96 = vector.broadcast %88 : vector<16x1xf32> to vector<16x32xf32>
    %97 = arith.subf %82, %96 : vector<16x32xf32>
    %cst_50 = arith.constant 9.99999974E-6 : f32
    %98 = vector.broadcast %cst_50 : f32 to vector<16x1xf32>
    %99 = arith.addf %95, %98 : vector<16x1xf32>
    %100 = math.rsqrt %99 : vector<16x1xf32>
    %101 = vector.broadcast %100 : vector<16x1xf32> to vector<16x32xf32>
    %102 = arith.mulf %97, %101 : vector<16x32xf32>
    %103 = vector.broadcast %83 : vector<1x32xf32> to vector<16x32xf32>
    %104 = arith.mulf %102, %103 : vector<16x32xf32>
    %105 = vector.broadcast %84 : vector<1x32xf32> to vector<16x32xf32>
    %106 = arith.addf %104, %105 : vector<16x32xf32>
    %107 = vector.extract_strided_slice %106 {offsets = [0, 0], sizes = [16, 16], strides = [1, 1]} : vector<16x32xf32> to vector<16x16xf32>
    %108 = vector.extract_strided_slice %106 {offsets = [0, 16], sizes = [16, 16], strides = [1, 1]} : vector<16x32xf32> to vector<16x16xf32>
    %109 = arith.maximumf %107, %108 : vector<16x16xf32>
    %c0_51 = arith.constant 0 : index
    %c0_52 = arith.constant 0 : index
    %110 = vector.load %arg17[%c0_51, %c0_52] : memref<16x16xf32, #tpu.memory_space<vmem>>, vector<16x16xf32>
    tpu.vector_store %arg17[%c0_51, %c0_52], %109 {strides = array<i32>} : memref<16x16xf32, #tpu.memory_space<vmem>>, vector<16x16xf32>,
    return
  }
  func.func @transform_0(%arg0: i32) -> (i32, i32, i32) {
    %c0_i32 = arith.constant 0 : i32
    %c0_i32_0 = arith.constant 0 : i32
    %c0_i32_1 = arith.constant 0 : i32
    return %arg0, %c0_i32, %c0_i32_0 : i32, i32, i32
  }
  func.func @transform_1(%arg0: i32) -> (i32, i32) {
    %c0_i32 = arith.constant 0 : i32
    %c0_i32_0 = arith.constant 0 : i32
    %c0_i32_1 = arith.constant 0 : i32
    return %c0_i32, %c0_i32_0 : i32, i32
  }
  func.func @transform_2(%arg0: i32) -> (i32, i32) {
    %c0_i32 = arith.constant 0 : i32
    %c0_i32_0 = arith.constant 0 : i32
    %c0_i32_1 = arith.constant 0 : i32
    return %c0_i32, %c0_i32_0 : i32, i32
  }
  func.func @transform_3(%arg0: i32) -> (i32, i32) {
    %c0_i32 = arith.constant 0 : i32
    %c0_i32_0 = arith.constant 0 : i32
    %c0_i32_1 = arith.constant 0 : i32
    return %c0_i32, %c0_i32_0 : i32, i32
  }
  func.func @transform_4(%arg0: i32) -> (i32, i32) {
    %c0_i32 = arith.constant 0 : i32
    %c0_i32_0 = arith.constant 0 : i32
    %c0_i32_1 = arith.constant 0 : i32
    return %c0_i32, %c0_i32_0 : i32, i32
  }
  func.func @transform_5(%arg0: i32) -> (i32, i32) {
    %c0_i32 = arith.constant 0 : i32
    %c0_i32_0 = arith.constant 0 : i32
    %c0_i32_1 = arith.constant 0 : i32
    return %c0_i32, %c0_i32_0 : i32, i32
  }
  func.func @transform_6(%arg0: i32) -> (i32, i32) {
    %c0_i32 = arith.constant 0 : i32
    %c0_i32_0 = arith.constant 0 : i32
    %c0_i32_1 = arith.constant 0 : i32
    return %c0_i32, %c0_i32_0 : i32, i32
  }
  func.func @transform_7(%arg0: i32) -> (i32, i32) {
    %c0_i32 = arith.constant 0 : i32
    %c0_i32_0 = arith.constant 0 : i32
    %c0_i32_1 = arith.constant 0 : i32
    return %c0_i32, %c0_i32_0 : i32, i32
  }
  func.func @transform_8(%arg0: i32) -> (i32, i32) {
    %c0_i32 = arith.constant 0 : i32
    %c0_i32_0 = arith.constant 0 : i32
    %c0_i32_1 = arith.constant 0 : i32
    return %c0_i32, %c0_i32_0 : i32, i32
  }
  func.func @transform_9(%arg0: i32) -> (i32, i32) {
    %c0_i32 = arith.constant 0 : i32
    %c0_i32_0 = arith.constant 0 : i32
    %c0_i32_1 = arith.constant 0 : i32
    return %c0_i32, %c0_i32_0 : i32, i32
  }
  func.func @transform_10(%arg0: i32) -> (i32, i32) {
    %c0_i32 = arith.constant 0 : i32
    %c0_i32_0 = arith.constant 0 : i32
    %c0_i32_1 = arith.constant 0 : i32
    return %c0_i32, %c0_i32_0 : i32, i32
  }
  func.func @transform_11(%arg0: i32) -> (i32, i32) {
    %c0_i32 = arith.constant 0 : i32
    %c0_i32_0 = arith.constant 0 : i32
    %c0_i32_1 = arith.constant 0 : i32
    return %c0_i32, %c0_i32_0 : i32, i32
  }
  func.func @transform_12(%arg0: i32) -> (i32, i32) {
    %c0_i32 = arith.constant 0 : i32
    %c0_i32_0 = arith.constant 0 : i32
    %c0_i32_1 = arith.constant 0 : i32
    return %c0_i32, %c0_i32_0 : i32, i32
  }
  func.func @transform_13(%arg0: i32) -> (i32, i32) {
    %c0_i32 = arith.constant 0 : i32
    %c0_i32_0 = arith.constant 0 : i32
    %c0_i32_1 = arith.constant 0 : i32
    return %c0_i32, %c0_i32_0 : i32, i32
  }
  func.func @transform_14(%arg0: i32) -> (i32, i32) {
    %c0_i32 = arith.constant 0 : i32
    %c0_i32_0 = arith.constant 0 : i32
    %c0_i32_1 = arith.constant 0 : i32
    return %c0_i32, %c0_i32_0 : i32, i32
  }
  func.func @transform_15(%arg0: i32) -> i32 {
    %c0_i32 = arith.constant 0 : i32
    %c0_i32_0 = arith.constant 0 : i32
    return %c0_i32 : i32
  }
  func.func @transform_16(%arg0: i32) -> (i32, i32) {
    %c0_i32 = arith.constant 0 : i32
    %c0_i32_0 = arith.constant 0 : i32
    return %arg0, %c0_i32 : i32, i32
  }
}

</mosaic_0001>

<bundles_post_ra>
// kernel: tpu_custom_call.1
= control target key start
LH: loop header
LB: loop body
LE: loop exit
PB: predicated region body
PF: predicated region fallthrough
CT: control target
= control target key end

     0   :  { %s1375_s0 = inlined_call_operand.vmem [shape: f32[2,8,32], index: 0, kind: input, shape index: {}]   ;;  %s1376_s1 = inlined_call_operand.hbm [shape: f32[8,32], index: 1, kind: input, shape index: {}]   ;;  %s1377_s2 = inlined_call_operand.vmem [shape: bf16[32,32], index: 2, kind: input, shape index: {}]   ;;  %s1378_s3 = inlined_call_operand.vmem [shape: bf16[32,32], index: 3, kind: input, shape index: {}]   ;;  %s1379_s4 = inlined_call_operand.vmem [shape: bf16[32,32], index: 4, kind: input, shape index: {}]   ;;  %s1380_s5 = inlined_call_operand.vmem [shape: bf16[32,32], index: 5, kind: input, shape index: {}]   ;;  %s1381_s6 = inlined_call_operand.vmem [shape: f32[1,32], index: 6, kind: input, shape index: {}]   ;;  %s1382_s7 = inlined_call_operand.vmem [shape: f32[1,32], index: 7, kind: input, shape index: {}]   ;;  %s1383_s8 = inlined_call_operand.vmem [shape: f32[1,32], index: 8, kind: input, shape index: {}]   ;;  %s1384_s9 = inlined_call_operand.vmem [shape: f32[1,32], index: 9, kind: input, shape index: {}]   ;;  %s1385_s10 = inlined_call_operand.vmem [shape: f32[1,32], index: 10, kind: input, shape index: {}]   ;;  %s1386_s11 = inlined_call_operand.hbm [shape: bf16[32,128], index: 11, kind: input, shape index: {}]   ;;  %s1387_s12 = inlined_call_operand.vmem [shape: f32[1,128], index: 12, kind: input, shape index: {}]   ;;  %s1388_s13 = inlined_call_operand.vmem [shape: bf16[128,32], index: 13, kind: input, shape index: {}]   ;;  %s1389_s14 = inlined_call_operand.vmem [shape: f32[1,32], index: 14, kind: input, shape index: {}]   ;;  %s1390_s15 = inlined_call_operand.<no memory space> [shape: f32[1], index: 15, kind: input, shape index: {}]   ;;  %s1391_s16 = inlined_call_operand.hbm [shape: f32[16,16], index: 16, kind: output, shape index: {}]  }
   0x1   :  { %1393 = sst [smem:[#allocation12_spill]] %s1375_s0 }
   0x2   :  { %22 = vsyncpa [#allocation4], 0 }
   0x3   :  { %23 = vsyncpa [#allocation7], 0 }
   0x4   :  { %24 = vsyncpa [#allocation5], 0  ;;  %s1120_s21 = smov [#allocation3]   ;;  %s1121_s23 = smov [#allocation6]  }
   0x5   :  { %s33_s22 = sshll.u32 %s1120_s21, 4  ;;  %s60_s24 = sshll.u32 %s1121_s23, 4  ;;  %s34_s22 = int_to_ptr.vmem [resolvable:$true] %s33_s22  ;;  %s61_s24 = int_to_ptr.vmem [resolvable:$true] %s60_s24 }
   0x6   :  { %s1062_s25 = scalar_lea.vmem %s34_s22, 128  ;;  %p1067_p1 = scmp.lt.s32.totalorder %s34_s22, %s34_s22 }
   0x7   :  { %p1063_p0 = scmp.ne.s32.totalorder %s34_s22, %s1062_s25  ;;  %p1068_p2 = scmp.lt.s32.totalorder %s1062_s25, %s1062_s25 }
   0x9   :  { %p1069_p3 = por %p1068_p2, %p1067_p1 }
   0xb   :  { %p1070_p4 = pnand %p1069_p3, %p1063_p0 }
   0xd   :  { %1073 = shalt.err (!%p1070_p4)
}
   0xe   :  { %36 = dma.hbm_to_vmem [thread:$0]  %s1376_s1, 128, %s34_s22, [#allocation4]  }
   0xf   :  { %s1082_s28 = scalar_lea.vmem %s61_s24, 256  ;;  %p1087_p6 = scmp.lt.s32.totalorder %s61_s24, %s61_s24 }
  0x10   :  { %p1083_p5 = scmp.ne.s32.totalorder %s61_s24, %s1082_s28  ;;  %p1088_p7 = scmp.lt.s32.totalorder %s1082_s28, %s1082_s28 }
  0x12   :  { %p1089_p8 = por %p1088_p7, %p1087_p6 }
  0x14   :  { %p1090_p9 = pnand %p1089_p8, %p1083_p5 }
  0x16   :  { %1093 = shalt.err (!%p1090_p9)
}
  0x17   :  { %s1122_s29 = smov 64   ;;  %s1123_s30 = smov 4  }
  0x18   :  { %66 = dma.hbm_to_vmem [thread:$0]  %s1386_s11, 256, %s61_s24, [#allocation7], %s1122_s29, %s1122_s29, %s1123_s30  }
  0x19   :  { %1114 = dma.done.wait [#allocation4], 128  }
  0x1a   :  { %1115 = vsyncadd [#allocation4], 4294967168 }
  0x1b   :  { %1116 = dma.done.wait [#allocation7], 256  }
  0x1c   :  { %1117 = vsyncadd [#allocation7], 4294967040  ;;  %v1124_v0 = vmov 0.0   ;;  %vm1125_vm0 = vmmov 0   ;;  %v1020_v1 = vld [vmem:[%s1377_s2 + $0x8] sm:$0xff]   ;;  %v1021_v2 = vld [vmem:[%s1377_s2] sm:$0xff]  }
  0x1d   :  { %926 = vmatprep.subr.bf16.mxu0 %v1124_v0  ;;  %930 = vmatprep.mubr.msk.bf16.mxu0 %vm1125_vm0, %v1124_v0  ;;  %s1394_s22 = sld [smem:[#allocation12_spill]]  ;;  %v84_v5 = vld [vmem:[#allocation3] sm:$0xff]  ;;  %vm104_vm1 = vcmask 261120   ;;  %v1022_v8 = vld [vmem:[%s1378_s3 + $0x8] sm:$0xff]   ;;  %vm389_vm2 = vcmask 1043456   ;;  %vm361_vm3 = vcmask 64512  }
  0x1e   :  { %950 = vmatprep.subr.bf16.mxu1 %v1124_v0  ;;  %952 = vmatprep.mubr.msk.bf16.mxu1 %vm1125_vm0, %v1124_v0  ;;  %v1023_v10 = vld [vmem:[%s1378_s3] sm:$0xff]   ;;  %v1024_v11 = vld [vmem:[%s1379_s4 + $0x8] sm:$0xff]   ;;  %s1126_s19 = smov 112   ;;  %vm839_vm6 = vcmask 130048   ;;  %s1127_s20 = smov [#allocation8]  }
  0x1f   :  { %927 = vmatpush3.bf16.msra.mxu0 %v1020_v1  ;;  %v1025_v12 = vld [vmem:[%s1379_s4] sm:$0xff]   ;;  %v1026_v63 = vld [vmem:[%s1380_s5 + $0x8] sm:$0xff]   ;;  %s847_s21 = sshll.u32 %s1127_s20, 4  ;;  %s848_s21 = int_to_ptr.vmem [resolvable:$true] %s847_s21 }
  0x20   :  { %928 = vmatprep.subr.bf16.mxu0 %v1124_v0  ;;  %v1027_v1 = vld [vmem:[%s1380_s5] sm:$0xff]   ;;  %p1099_p11 = scmp.lt.s32.totalorder %s848_s21, %s848_s21 }
  0x23   :  { %v82_v3 = vld [vmem:[%s1394_s22] sm:$0xff]  ;;  %v83_v4 = vld [vmem:[%s1394_s22 + $0x8] sm:$0xff]  ;;  %929 = vmatpush3.bf16.msra.mxu0 %v1021_v2 }
  0x24   :  { %v1240_v6 = vadd.f32 %v84_v5, %v82_v3  ;;  %v1242_v7 = vadd.f32 %v84_v5, %v83_v4  ;;  %934 = vmatprep.subr.bf16.mxu0 %v1124_v0 }
  0x26   :  { %v87_v9 = vpack.c.bf16 %v1242_v7, %v1240_v6 }
  0x28   :  { %931 = vmatmul.mubr.msk.bf16.vlgmr.msra.gmra.mxu0 %vm104_vm1, %v87_v9 }
  0x29   :  { %935 = vmatpush3.bf16.msra.mxu0 %v1022_v8  ;;  %938 = vmatprep.mubr.msk.bf16.mxu0 %vm1125_vm0, %v1124_v0 }
  0x2a   :  { %936 = vmatprep.subr.bf16.mxu0 %v1124_v0 }
  0x2d   :  { %937 = vmatpush3.bf16.msra.mxu0 %v1023_v10 }
  0x2e   :  { %942 = vmatprep.subr.bf16.mxu0 %v1124_v0 }
  0x30   :  { %939 = vmatmul.mubr.msk.bf16.vlgmr.msra.gmra.mxu0 %vm104_vm1, %v87_v9 }
  0x31   :  { %946 = vmatprep.mubr.msk.bf16.mxu0 %vm1125_vm0, %v1124_v0  ;;  %943 = vmatpush3.bf16.msra.mxu0 %v1024_v11 }
  0x32   :  { %944 = vmatprep.subr.bf16.mxu0 %v1124_v0 }
  0x35   :  { %945 = vmatpush3.bf16.msra.mxu0 %v1025_v12 }
  0x36   :  { %956 = vmatprep.subr.bf16.mxu0 %v1124_v0 }
  0x38   :  { %947 = vmatmul.mubr.msk.bf16.vlgmr.msra.gmra.mxu0 %vm104_vm1, %v87_v9 }
  0x39   :  { %958 = vmatprep.mubr.msk.bf16.mxu0 %vm1125_vm0, %v1124_v0 }
  0xe8   :  { %v142_v13 = vpop.f32.mrf.mxu0 }
  0xe9   :  { %v263_v25 = vpack.c.bf16 %v142_v13, %v142_v13  ;;  %v873_v13 = vld [vmem:[%s1381_s6] ss:$0 sm:$0xff] }
  0xea   :  { %v932_v14 = vpop.f32.mrf.mxu0 }
  0xec   :  { %v145_v15 = vpop.f32.mrf.mxu0 }
  0xed   :  { %v264_v26 = vpack.c.bf16 %v145_v15, %v145_v15 }
  0xee   :  { %v933_v16 = vpop.f32.mrf.mxu0 }
  0xf0   :  { %v199_v17 = vpop.f32.mrf.mxu0 }
  0xf1   :  { %v265_v18 = vpack.c.bf16 %v199_v17, %v199_v17 }
  0xf2   :  { %v940_v19 = vpop.f32.mrf.mxu0 }
  0xf3   :  { %v273_v20 = vsel %vm104_vm1, %v265_v18, 0 }
  0xf4   :  { %v202_v21 = vpop.f32.mrf.mxu0  ;;  %951 = vmatpush3.bf16.xpose.msra.mxu1 %v273_v20 }
  0xf5   :  { %v266_v22 = vpack.c.bf16 %v202_v21, %v202_v21  ;;  %962 = vmatprep.subr.bf16.mxu1 %v1124_v0 }
  0xf6   :  { %v941_v23 = vpop.f32.mrf.mxu0 }
  0xf7   :  { %v319_v24 = vsel %vm104_vm1, %v266_v22, 0 }
  0xf8   :  { %957 = vmatpush3.bf16.xpose.msra.mxu0 %v319_v24  ;;  %v256_v27 = vpop.f32.mrf.mxu0 }
  0xf9   :  { %968 = vmatprep.subr.bf16.mxu0 %v1124_v0  ;;  %v267_v28 = vpack.c.bf16 %v256_v27, %v256_v27 }
  0xfa   :  { %v948_v29 = vpop.f32.mrf.mxu0 }
  0xfb   :  { %953 = vmatmul.mubr.msk.bf16.vlgmr.msra.gmra.mxu1 %vm104_vm1, %v263_v25  ;;  %v391_v30 = vsel %vm389_vm2, %v267_v28, 0 }
  0xfc   :  { %964 = vmatprep.mubr.msk.bf16.mxu1 %vm1125_vm0, %v1124_v0  ;;  %v259_v31 = vpop.f32.mrf.mxu0  ;;  %963 = vmatpush3.bf16.msra.mxu1 %v391_v30 }
  0xfd   :  { %v268_v32 = vpack.c.bf16 %v259_v31, %v259_v31  ;;  %974 = vmatprep.subr.bf16.mxu1 %v1124_v0 }
  0xfe   :  { %v949_v33 = vpop.f32.mrf.mxu0 }
  0xff   :  { %959 = vmatmul.mubr.msk.bf16.vlgmr.msra.gmra.mxu0 %vm104_vm1, %v264_v26  ;;  %v437_v34 = vsel %vm389_vm2, %v268_v32, 0  ;;  %v1028_v33 = vld [vmem:[#allocation6 + $0x8] sm:$0xff]  }
 0x100   :  { %970 = vmatprep.mubr.msk.bf16.mxu0 %vm1125_vm0, %v1124_v0  ;;  %969 = vmatpush3.bf16.msra.mxu0 %v437_v34  ;;  %v1030_v34 = vld [vmem:[%s1388_s13 + $0x38] sm:$0xff]  }
 0x101   :  { %982 = vmatprep.subr.bf16.mxu0 %v1124_v0 }
 0x1bb   :  { %v309_v35 = vpop.f32.mrf.mxu1 }
 0x1bc   :  { %v362_v36 = vsel %vm361_vm3, %v309_v35, -inf }
 0x1bd   :  { %363 = vmax.xlane.f32.xlu0 %v362_v36  ;;  %v954_v37 = vpop.f32.mrf.mxu1  ;;  %v1032_v36 = vld [vmem:[%s1388_s13 + $0x28] sm:$0xff]  }
 0x1be   :  { %v1033_v37 = vld [vmem:[%s1388_s13 + $0x20] sm:$0xff]  }
 0x1bf   :  { %v312_v38 = vpop.f32.mrf.mxu1  ;;  %v355_v39 = vpop.f32.mrf.mxu0 }
 0x1c0   :  { %v365_v40 = vsel %vm361_vm3, %v355_v39, -inf  ;;  %v1034_v38 = vld [vmem:[%s1388_s13 + $0x18] sm:$0xff]  }
 0x1c1   :  { %v955_v41 = vpop.f32.mrf.mxu1  ;;  %366 = vmax.xlane.f32.xlu0 %v365_v40  ;;  %v960_v42 = vpop.f32.mrf.mxu0 }
 0x1c3   :  { %v358_v43 = vpop.f32.mrf.mxu0 }
 0x1c5   :  { %v961_v44 = vpop.f32.mrf.mxu0 }
 0x246   :  { %v364_v45 = vpop.xlane.xlu0 %363 }
 0x247   :  { %v368_v46 = vsub.f32 %v309_v35, %v364_v45  ;;  %v1031_v35 = vld [vmem:[%s1388_s13 + $0x30] sm:$0xff]  }
 0x249   :  { %v370_v47 = vmul.f32 1.442695, %v368_v46 }
 0x24a   :  { %v367_v48 = vpop.xlane.xlu0 %366 }
 0x24b   :  { %1038 = vpow2.f32 %v370_v47  ;;  %v369_v49 = vsub.f32 %v355_v39, %v367_v48  ;;  %v877_v47 = vld [vmem:[%s1382_s7] ss:$0 sm:$0xff] }
 0x24d   :  { %v372_v50 = vmul.f32 1.442695, %v369_v49 }
 0x24f   :  { %1040 = vpow2.f32 %v372_v50 }
 0x258   :  { %v1039_v51 = vpop.eup %1038 }
 0x259   :  { %v374_v52 = vsel %vm361_vm3, %v1039_v51, 0.0 }
 0x25a   :  { %375 = vadd.xlane.f32.xlu1 %v374_v52 }
 0x25c   :  { %v1041_v53 = vpop.eup %1040 }
 0x25d   :  { %v377_v54 = vsel %vm361_vm3, %v1041_v53, 0.0 }
 0x25e   :  { %378 = vadd.xlane.f32.xlu1 %v377_v54 }
 0x2e3   :  { %v376_v55 = vpop.xlane.xlu1 %375 }
 0x2e4   :  { %1042 = vrcp.f32 %v376_v55 }
 0x2e7   :  { %v379_v56 = vpop.xlane.xlu1 %378 }
 0x2e8   :  { %1044 = vrcp.f32 %v379_v56  ;;  %v1035_v56 = vld [vmem:[%s1388_s13 + $0x10] sm:$0xff]  }
 0x2f1   :  { %v1043_v57 = vpop.eup %1042 }
 0x2f2   :  { %v382_v58 = vmul.f32 %v1043_v57, %v1039_v51  ;;  %v878_v51 = vld [vmem:[%s1383_s8] ss:$0 sm:$0xff]  ;;  %v1036_v57 = vld [vmem:[%s1388_s13 + $0x8] sm:$0xff]  }
 0x2f4   :  { %v384_v59 = vpack.c.bf16 %v382_v58, %v382_v58  ;;  %v1037_v58 = vld [vmem:[%s1388_s13] sm:$0xff]  }
 0x2f5   :  { %v1045_v60 = vpop.eup %1044 }
 0x2f6   :  { %965 = vmatmul.mubr.msk.bf16.vlgmr.msra.gmra.mxu1 %vm361_vm3, %v384_v59  ;;  %v383_v61 = vmul.f32 %v1045_v60, %v1041_v53  ;;  %v879_v59 = vld [vmem:[%s1387_s12] ss:$0 sm:$0xff] }
 0x2f7   :  { %978 = vmatprep.mubr.msk.bf16.mxu1 %vm1125_vm0, %v1124_v0  ;;  %975 = vmatpush3.bf16.msra.mxu1 %v1026_v63 }
 0x2f8   :  { %v385_v62 = vpack.c.bf16 %v383_v61, %v383_v61  ;;  %976 = vmatprep.subr.bf16.mxu1 %v1124_v0 }
 0x2fa   :  { %971 = vmatmul.mubr.msk.bf16.vlgmr.msra.gmra.mxu0 %vm361_vm3, %v385_v62  ;;  %v665_v62 = vstv %s1390_s15 }
 0x2fb   :  { %986 = vmatprep.mubr.msk.bf16.mxu0 %vm1125_vm0, %v1124_v0  ;;  %977 = vmatpush3.bf16.msra.mxu1 %v1027_v1 }
 0x2fc   :  { %990 = vmatprep.subr.bf16.mxu1 %v1124_v0  ;;  %983 = vmatpush3.bf16.msra.mxu0 %v1028_v33 }
 0x2fd   :  { %984 = vmatprep.subr.bf16.mxu0 %v1124_v0 }
 0x3b6   :  { %v427_v2 = vpop.f32.mrf.mxu1 }
 0x3b8   :  { %v966_v3 = vpop.f32.mrf.mxu1 }
 0x3ba   :  { %v430_v4 = vpop.f32.mrf.mxu1  ;;  %v473_v5 = vpop.f32.mrf.mxu0 }
 0x3bb   :  { %v479_v8 = vpack.c.bf16 %v473_v5, %v427_v2 }
 0x3bc   :  { %v967_v9 = vpop.f32.mrf.mxu1  ;;  %v972_v10 = vpop.f32.mrf.mxu0 }
 0x3bd   :  { %979 = vmatmul.mubr.msk.bf16.vlgmr.msra.gmra.mxu1 %vm104_vm1, %v479_v8  ;;  %v883_v10 = vld [vmem:[%s1389_s14] ss:$0 sm:$0xff] }
 0x3be   :  { %v476_v11 = vpop.f32.mrf.mxu0  ;;  %1006 = vmatprep.mubr.msk.bf16.mxu1 %vm1125_vm0, %v1124_v0  ;;  %991 = vmatpush3.bf16.msra.mxu1 %v1030_v34 }
 0x3bf   :  { %992 = vmatprep.subr.bf16.mxu1 %v1124_v0 }
 0x3c0   :  { %v973_v12 = vpop.f32.mrf.mxu0 }
 0x3c2   :  { %993 = vmatpush3.bf16.msra.mxu1 %v1031_v35 }
 0x3c3   :  { %994 = vmatprep.subr.bf16.mxu1 %v1124_v0 }
 0x3c6   :  { %995 = vmatpush3.bf16.msra.mxu1 %v1032_v36  ;;  %v892_v36 = vld [vmem:[%s1384_s9] ss:$0 sm:$0xff]  ;;  %s1094_s9 = scalar_lea.vmem %s848_s21, 256 }
 0x3c7   :  { %996 = vmatprep.subr.bf16.mxu1 %v1124_v0  ;;  %p1095_p10 = scmp.ne.s32.totalorder %s848_s21, %s1094_s9  ;;  %p1100_p12 = scmp.lt.s32.totalorder %s1094_s9, %s1094_s9 }
 0x3c9   :  { %p1101_p13 = por %p1100_p12, %p1099_p11 }
 0x3ca   :  { %997 = vmatpush3.bf16.msra.mxu1 %v1033_v37 }
 0x3cb   :  { %998 = vmatprep.subr.bf16.mxu1 %v1124_v0  ;;  %p1102_p0 = pnand %p1101_p13, %p1095_p10 }
 0x3ce   :  { %999 = vmatpush3.bf16.msra.mxu1 %v1034_v38  ;;  %v893_v38 = vld [vmem:[%s1385_s10] ss:$0 sm:$0xff] }
 0x3cf   :  { %1000 = vmatprep.subr.bf16.mxu1 %v1124_v0 }
 0x3d2   :  { %1001 = vmatpush3.bf16.msra.mxu1 %v1035_v56 }
 0x3d3   :  { %1002 = vmatprep.subr.bf16.mxu1 %v1124_v0 }
 0x3d6   :  { %1003 = vmatpush3.bf16.msra.mxu1 %v1036_v57 }
 0x3d7   :  { %1004 = vmatprep.subr.bf16.mxu1 %v1124_v0 }
 0x3da   :  { %1005 = vmatpush3.bf16.msra.mxu1 %v1037_v58 }
 0x47d   :  { %v540_v14 = vpop.f32.mrf.mxu1 }
 0x47e   :  { %v541_v15 = vadd.f32 %v873_v13, %v540_v14 }
 0x47f   :  { %v980_v16 = vpop.f32.mrf.mxu1 }
 0x480   :  { %v547_v17 = vadd.f32 %v541_v15, %v1240_v6 }
 0x481   :  { %v543_v18 = vpop.f32.mrf.mxu1 }
 0x482   :  { %v544_v19 = vadd.f32 %v873_v13, %v543_v18  ;;  %v551_v20 = vsel %vm104_vm1, %v547_v17, 0.0 }
 0x483   :  { %552 = vadd.xlane.f32.xlu0 %v551_v20  ;;  %v981_v21 = vpop.f32.mrf.mxu1 }
 0x484   :  { %v548_v22 = vadd.f32 %v544_v19, %v1242_v7  ;;  %v1029_v7 = vld [vmem:[#allocation6] sm:$0xff]  }
 0x485   :  { %985 = vmatpush3.bf16.msra.mxu0 %v1029_v7 }
 0x486   :  { %v554_v23 = vsel %vm104_vm1, %v548_v22, 0.0 }
 0x487   :  { %555 = vadd.xlane.f32.xlu1 %v554_v23 }
 0x50c   :  { %v553_v24 = vpop.xlane.xlu0 %552 }
 0x50d   :  { %v558_v25 = vmul.f32 0.03125, %v553_v24 }
 0x50f   :  { %v560_v26 = vsub.f32 %v547_v17, %v558_v25 }
 0x510   :  { %v556_v27 = vpop.xlane.xlu1 %555 }
 0x511   :  { %v559_v28 = vmul.f32 0.03125, %v556_v27  ;;  %v562_v29 = vmul.f32 %v560_v26, %v560_v26 }
 0x513   :  { %v561_v30 = vsub.f32 %v548_v22, %v559_v28  ;;  %v564_v6 = vsel %vm104_vm1, %v562_v29, 0.0 }
 0x514   :  { %565 = vadd.xlane.f32.xlu0 %v564_v6 }
 0x515   :  { %v563_v31 = vmul.f32 %v561_v30, %v561_v30 }
 0x517   :  { %v567_v32 = vsel %vm104_vm1, %v563_v31, 0.0 }
 0x518   :  { %568 = vadd.xlane.f32.xlu1 %v567_v32 }
 0x59d   :  { %v566_v39 = vpop.xlane.xlu0 %565 }
 0x59e   :  { %v570_v40 = vmul.f32 0.03125, %v566_v39 }
 0x5a0   :  { %v572_v41 = vadd.f32 1e-05, %v570_v40 }
 0x5a1   :  { %v569_v42 = vpop.xlane.xlu1 %568 }
 0x5a2   :  { %1046 = vrsqrt.f32 %v572_v41  ;;  %v571_v43 = vmul.f32 0.03125, %v569_v42 }
 0x5a4   :  { %v573_v44 = vadd.f32 1e-05, %v571_v43 }
 0x5a6   :  { %1048 = vrsqrt.f32 %v573_v44 }
 0x5af   :  { %v1047_v45 = vpop.eup %1046 }
 0x5b0   :  { %v576_v46 = vmul.f32 %v1047_v45, %v560_v26 }
 0x5b2   :  { %v584_v50 = vmul.f32 %v877_v47, %v576_v46 }
 0x5b3   :  { %v1049_v48 = vpop.eup %1048 }
 0x5b4   :  { %v577_v49 = vmul.f32 %v1049_v48, %v561_v30  ;;  %v592_v53 = vadd.f32 %v878_v51, %v584_v50 }
 0x5b6   :  { %v585_v52 = vmul.f32 %v877_v47, %v577_v49 }
 0x5b8   :  { %v593_v54 = vadd.f32 %v878_v51, %v585_v52 }
 0x5ba   :  { %v594_v55 = vpack.c.bf16 %v593_v54, %v592_v53 }
 0x5bc   :  { %987 = vmatmul.mubr.msk.bf16.vlgmr.msra.gmra.mxu0 %vm104_vm1, %v594_v55 }
 0x67c   :  { %v655_v60 = vpop.f32.mrf.mxu0 }
 0x67d   :  { %v656_v61 = vadd.f32 %v879_v59, %v655_v60 }
 0x67e   :  { %v988_v63 = vpop.f32.mrf.mxu0 }
 0x67f   :  { %v666_v2 = vmul.f32 %v665_v62, %v656_v61  ;;  %vm663_vm4 = vcmp.ge.f32.partialorder %v656_v61, 0.0 }
 0x680   :  { %v658_v1 = vpop.f32.mrf.mxu0 }
 0x681   :  { %v659_v3 = vadd.f32 %v879_v59, %v658_v1  ;;  %v668_v5 = vsel %vm663_vm4, %v656_v61, %v666_v2 }
 0x682   :  { %v989_v0 = vpop.f32.mrf.mxu0 }
 0x683   :  { %vm664_vm5 = vcmp.ge.f32.partialorder %v659_v3, 0.0  ;;  %v667_v4 = vmul.f32 %v665_v62, %v659_v3 }
 0x685   :  { %v669_v8 = vsel %vm664_vm5, %v659_v3, %v667_v4 }
 0x686   :  { %v670_v9 = vpack.c.bf16 %v669_v8, %v668_v5 }
 0x688   :  { %1007 = vmatmul.mubr.bf16.vlgmr.msra.gmra.mxu1 %v670_v9 }
 0x748   :  { %v776_v11 = vpop.f32.mrf.mxu1 }
 0x749   :  { %v777_v12 = vadd.f32 %v883_v10, %v776_v11 }
 0x74a   :  { %v1008_v13 = vpop.f32.mrf.mxu1 }
 0x74b   :  { %v783_v14 = vadd.f32 %v777_v12, %v592_v53 }
 0x74c   :  { %v779_v15 = vpop.f32.mrf.mxu1 }
 0x74d   :  { %v780_v16 = vadd.f32 %v883_v10, %v779_v15  ;;  %v787_v17 = vsel %vm104_vm1, %v783_v14, 0.0 }
 0x74e   :  { %788 = vadd.xlane.f32.xlu0 %v787_v17  ;;  %v1009_v18 = vpop.f32.mrf.mxu1 }
 0x74f   :  { %v784_v19 = vadd.f32 %v780_v16, %v593_v54 }
 0x751   :  { %v790_v20 = vsel %vm104_vm1, %v784_v19, 0.0 }
 0x752   :  { %791 = vadd.xlane.f32.xlu1 %v790_v20 }
 0x7d7   :  { %v789_v21 = vpop.xlane.xlu0 %788 }
 0x7d8   :  { %v793_v22 = vmul.f32 0.03125, %v789_v21 }
 0x7da   :  { %v795_v23 = vsub.f32 %v783_v14, %v793_v22 }
 0x7db   :  { %v792_v24 = vpop.xlane.xlu1 %791 }
 0x7dc   :  { %v794_v25 = vmul.f32 0.03125, %v792_v24  ;;  %v797_v26 = vmul.f32 %v795_v23, %v795_v23 }
 0x7de   :  { %v796_v27 = vsub.f32 %v784_v19, %v794_v25  ;;  %v799_v28 = vsel %vm104_vm1, %v797_v26, 0.0 }
 0x7df   :  { %800 = vadd.xlane.f32.xlu0 %v799_v28 }
 0x7e0   :  { %v798_v29 = vmul.f32 %v796_v27, %v796_v27 }
 0x7e2   :  { %v802_v30 = vsel %vm104_vm1, %v798_v29, 0.0 }
 0x7e3   :  { %803 = vadd.xlane.f32.xlu1 %v802_v30 }
 0x868   :  { %v801_v6 = vpop.xlane.xlu0 %800 }
 0x869   :  { %v805_v31 = vmul.f32 0.03125, %v801_v6 }
 0x86b   :  { %v807_v32 = vadd.f32 1e-05, %v805_v31 }
 0x86c   :  { %v804_v33 = vpop.xlane.xlu1 %803 }
 0x86d   :  { %1050 = vrsqrt.f32 %v807_v32  ;;  %v806_v7 = vmul.f32 0.03125, %v804_v33 }
 0x86f   :  { %v808_v34 = vadd.f32 1e-05, %v806_v7 }
 0x871   :  { %1052 = vrsqrt.f32 %v808_v34 }
 0x87a   :  { %v1051_v35 = vpop.eup %1050 }
 0x87b   :  { %v811_v37 = vmul.f32 %v1051_v35, %v795_v23 }
 0x87d   :  { %v819_v39 = vmul.f32 %v892_v36, %v811_v37 }
 0x87e   :  { %v1053_v40 = vpop.eup %1052 }
 0x87f   :  { %v827_v41 = vadd.f32 %v893_v38, %v819_v39  ;;  %v812_v42 = vmul.f32 %v1053_v40, %v796_v27 }
 0x881   :  { %831 = vrot.lane.b32.xlu0 %v827_v41, %s1126_s19  ;;  %v820_v43 = vmul.f32 %v892_v36, %v812_v42 }
 0x883   :  { %v828_v44 = vadd.f32 %v893_v38, %v820_v43 }
 0x885   :  { %833 = vrot.lane.b32.xlu1 %v828_v44, %s1126_s19 }
 0x8f3   :  { %v832_v45 = vpop.permute.xlu0 %831 }
 0x8f4   :  { %v837_v46 = vmax.f32 %v827_v41, %v832_v45 }
 0x8f6   :  { %840 = vst.msk [vmem:[#allocation8] sm:$0xff] %vm839_vm6, %v837_v46 }
 0x8f7   :  { %v834_v47 = vpop.permute.xlu1 %833 }
 0x8f8   :  { %v838_v48 = vmax.f32 %v828_v44, %v834_v47 }
 0x8fa   :  { %841 = vst.msk [vmem:[#allocation8 + $0x8] sm:$0xff] %vm839_vm6, %v838_v48 }
 0x8fb   :  { %1105 = shalt.err (!%p1102_p0)
}
 0x8fc   :  { %s1128_s10 = smov 128   ;;  %s1129_s22 = smov 8  }
 0x8fd   :  { %853 = dma.vmem_to_hbm [thread:$0]  %s848_s21, 256, %s1391_s16, [#allocation5], %s1128_s10, %s1128_s10, %s1129_s22  }
 0x8fe   :  { %1118 = dma.done.wait [#allocation5], 256  }
 0x8ff   :  { %1119 = vsyncadd [#allocation5], 4294967040 }
 0x900   :  { %857 = vsyncpa [#allocation4], 1 }
 0x901   :  { %858 = vsyncpa [#allocation7], 1 }
 0x902   :  { %859 = vsyncpa [#allocation5], 1 }

</bundles_post_ra>
